<compile_context>
chip_gen: v7x
topology: tpu7x:2x2x1
jax: 0.10.0
libtpu: 0.0.40
codegen_flags: <defaults>
</compile_context>

<pallas_src>
import functools

import jax
import jax.numpy as jnp
from jax.experimental import pallas as pl
from jax.experimental.pallas import tpu as pltpu

LANE = 128
SUBLANE = 8
# ~2 MiB per block per buffer: with 1 input + 1 output, each double-buffered,
# total VMEM ~= 4x block = 8 MiB -> fits default scoped VMEM on v5e/v6e/v7x.
_TARGET_BLOCK_BYTES = 2 * 1024 * 1024


def _leaky_kernel(x_ref, o_ref, *, alpha, beta, adpt_en):
    # Compute in f32 for precision, cast back to the output dtype.
    x = x_ref[...].astype(jnp.float32)
    if adpt_en:
        y = alpha * x + beta
    else:
        y = x + beta
    o_ref[...] = y.astype(o_ref.dtype)


def _leaky_2d(x2d: jax.Array, alpha: float, beta: float, adpt_en: bool) -> jax.Array:
    """Run the Pallas kernel on a lane-dense (rows, width) slab."""
    rows, width = x2d.shape
    itemsize = jnp.dtype(x2d.dtype).itemsize

    rows_budget = max(1, _TARGET_BLOCK_BYTES // (width * itemsize))
    if rows <= rows_budget:
        block_rows = rows  # full extent -> always a legal block shape
    else:
        block_rows = max(SUBLANE, (rows_budget // SUBLANE) * SUBLANE)

    grid = (pl.cdiv(rows, block_rows),)

    kernel = functools.partial(
        _leaky_kernel,
        alpha=float(alpha),
        beta=float(beta),
        adpt_en=bool(adpt_en),
    )

    return pl.pallas_call(
        kernel,
        out_shape=jax.ShapeDtypeStruct((rows, width), x2d.dtype),
        grid=grid,
        in_specs=[pl.BlockSpec((block_rows, width), lambda i: (i, 0))],
        out_specs=pl.BlockSpec((block_rows, width), lambda i: (i, 0)),
        compiler_params=pltpu.CompilerParams(
            dimension_semantics=("parallel",),
        ),
    )(x2d)


def leaky(x: jax.Array, alpha: float, beta: float, adpt_en: bool = True) -> jax.Array:
    """Exponential-decay (leaky) elementwise op: y = alpha*x + beta."""
    assert alpha <= 1
    orig_shape = x.shape
    n = x.size
    x_flat = x.reshape(-1)

    # Pick the widest lane-dense last dim (multiple of 128) that divides n.
    width = 0
    for cand in (8192, 4096, 2048, 1024, 512, 256, 128):
        if n % cand == 0:
            width = cand
            break

    if width:
        out2d = _leaky_2d(x_flat.reshape(n // width, width), alpha, beta, adpt_en)
        return out2d.reshape(orig_shape)

    # Flat size is not a multiple of 128: run the aligned bulk through the
    # kernel and handle the tiny (<128 element) tail in plain JAX.
    bulk = (n // LANE) * LANE
    if bulk == 0:
        # Too small for a kernel; a single fused XLA elementwise op is optimal.
        y = alpha * x + beta if adpt_en else x + beta
        return y.astype(x.dtype)

    head = _leaky_2d(x_flat[:bulk].reshape(bulk // LANE, LANE), alpha, beta, adpt_en)
    tail = x_flat[bulk:]
    tail = (alpha * tail + beta if adpt_en else tail + beta).astype(x.dtype)
    return jnp.concatenate([head.reshape(-1), tail]).reshape(orig_shape)


if __name__ == "__main__":
    key = jax.random.PRNGKey(0)
    # NCHW input consistent with a conv-style feature map.
    x = jax.random.normal(key, (2, 4, 16, 16), dtype=jnp.float32)

    alpha, beta = 0.9, 0.1

    # adpt_en=True path.
    y = jax.block_until_ready(leaky(x, alpha, beta, adpt_en=True))
    y_ref = alpha * x + beta
    assert y.shape == x.shape and y.dtype == x.dtype
    assert jnp.allclose(y, y_ref, atol=1e-6), "mismatch vs reference (adpt_en=True)"

    # adpt_en=False path.
    y2 = jax.block_until_ready(leaky(x, alpha, beta, adpt_en=False))
    assert jnp.allclose(y2, x + beta, atol=1e-6), "mismatch vs reference (adpt_en=False)"

    print("KERNEL_OK")
</pallas_src>

<mosaic_0001>
module attributes {stable_mosaic.version = 11 : i64} {
  func.func @_leaky_kernel(%arg0: i32, %arg1: memref<1x2048xf32, #tpu.memory_space<vmem>>, %arg2: memref<1x2048xf32, #tpu.memory_space<vmem>>) attributes {dimension_semantics = [#tpu.dimension_semantics<parallel>], iteration_bounds = array<i64: 1>, scalar_prefetch = 0 : i64, scratch_operands = 0 : i64, tpu.core_type = #tpu.core_type<tc>, window_params = [{transform_indices = @transform_0, window_bounds = array<i64: 1, 2048>}, {transform_indices = @transform_1, window_bounds = array<i64: 1, 2048>}]} {
    %c0 = arith.constant 0 : index
    %c0_0 = arith.constant 0 : index
    %0 = vector.load %arg1[%c0, %c0_0] : memref<1x2048xf32, #tpu.memory_space<vmem>>, vector<1x2048xf32>
    %cst = arith.constant 0.899999976 : f32
    %1 = vector.broadcast %cst : f32 to vector<1x2048xf32>
    %2 = arith.mulf %1, %0 : vector<1x2048xf32>
    %cst_1 = arith.constant 1.000000e-01 : f32
    %3 = vector.broadcast %cst_1 : f32 to vector<1x2048xf32>
    %4 = arith.addf %2, %3 : vector<1x2048xf32>
    %c0_2 = arith.constant 0 : index
    %c0_3 = arith.constant 0 : index
    %5 = vector.load %arg2[%c0_2, %c0_3] : memref<1x2048xf32, #tpu.memory_space<vmem>>, vector<1x2048xf32>
    tpu.vector_store %arg2[%c0_2, %c0_3], %4 {strides = array<i32>} : memref<1x2048xf32, #tpu.memory_space<vmem>>, vector<1x2048xf32>,
    return
  }
  func.func @transform_0(%arg0: i32) -> (i32, i32) {
    %c0_i32 = arith.constant 0 : i32
    %c0_i32_0 = arith.constant 0 : i32
    return %arg0, %c0_i32 : i32, i32
  }
  func.func @transform_1(%arg0: i32) -> (i32, i32) {
    %c0_i32 = arith.constant 0 : i32
    %c0_i32_0 = arith.constant 0 : i32
    return %arg0, %c0_i32 : i32, i32
  }
}

</mosaic_0001>

<bundles_post_ra>
// kernel: tpu_custom_call.1
= control target key start
LH: loop header
LB: loop body
LE: loop exit
PB: predicated region body
PF: predicated region fallthrough
CT: control target
= control target key end

     0   :  { %6 = vsyncpa [#allocation3], 0  ;;  %s130_s0 = inlined_call_operand.hbm [shape: f32[1,2048], index: 0, kind: input, shape index: {}]   ;;  %s131_s1 = inlined_call_operand.hbm [shape: f32[1,2048], index: 1, kind: output, shape index: {}]  }
   0x1   :  { %7 = vsyncpa [#allocation4], 0  ;;  %s94_s6 = smov [#allocation2]   ;;  %s46_s10 = scalar_lea.hbm %s130_s0, 256 }
   0x2   :  { %s14_s7 = sshll.u32 %s94_s6, 4  ;;  %p47_p0 = scmp.ne.s32.totalorder %s130_s0, %s46_s10  ;;  %s15_s7 = int_to_ptr.vmem [resolvable:$true] %s14_s7 }
   0x3   :  { %p50_p1 = scmp.lt.u32.totalorder %s46_s10, %s130_s0 }
   0x5   :  { %p52_p2 = pnand %p50_p1, %p47_p0 }
   0x7   :  { %55 = shalt.err (!%p52_p2)
}
   0x8   :  { %s56_s15 = scalar_lea.vmem %s15_s7, 256  ;;  %p61_p4 = scmp.lt.s32.totalorder %s15_s7, %s15_s7 }
   0x9   :  { %p57_p3 = scmp.ne.s32.totalorder %s15_s7, %s56_s15  ;;  %p62_p5 = scmp.lt.s32.totalorder %s56_s15, %s56_s15 }
   0xb   :  { %p63_p6 = por %p62_p5, %p61_p4 }
   0xd   :  { %p64_p7 = pnand %p63_p6, %p57_p3 }
   0xf   :  { %67 = shalt.err (!%p64_p7)
}
  0x10   :  { %17 = dma.hbm_to_vmem [thread:$0]  %s130_s0, 256, %s15_s7, [#allocation3]  }
  0x11   :  { %90 = dma.done.wait [#allocation3], 256  }
  0x12   :  { %91 = vsyncadd [#allocation3], 4294967040  ;;  %v21_v0 = vld [vmem:[#allocation2] sm:$0xff]  ;;  %v22_v1 = vld [vmem:[#allocation2 + $0x8] sm:$0xff]  ;;  %s95_s18 = smov [#allocation5]  }
  0x13   :  { %s35_s19 = sshll.u32 %s95_s18, 4  ;;  %v23_v2 = vmul.f32 0.9, %v21_v0  ;;  %v24_v3 = vmul.f32 0.9, %v22_v1  ;;  %s36_s19 = int_to_ptr.vmem [resolvable:$true] %s35_s19 }
  0x14   :  { %s68_s20 = scalar_lea.vmem %s36_s19, 256  ;;  %p73_p9 = scmp.lt.s32.totalorder %s36_s19, %s36_s19 }
  0x15   :  { %v25_v4 = vadd.f32 0.1, %v23_v2  ;;  %v26_v5 = vadd.f32 0.1, %v24_v3  ;;  %p69_p8 = scmp.ne.s32.totalorder %s36_s19, %s68_s20  ;;  %p74_p10 = scmp.lt.s32.totalorder %s68_s20, %s68_s20 }
  0x17   :  { %27 = vst [vmem:[#allocation5] sm:$0xff] %v25_v4  ;;  %28 = vst [vmem:[#allocation5 + $0x8] sm:$0xff] %v26_v5  ;;  %p75_p11 = por %p74_p10, %p73_p9 }
  0x19   :  { %p76_p12 = pnand %p75_p11, %p69_p8 }
  0x1b   :  { %79 = shalt.err (!%p76_p12)
}
  0x1c   :  { %s80_s22 = scalar_lea.hbm %s131_s1, 256 }
  0x1d   :  { %p81_p13 = scmp.ne.s32.totalorder %s131_s1, %s80_s22  ;;  %p84_p0 = scmp.lt.u32.totalorder %s80_s22, %s131_s1 }
  0x1f   :  { %p86_p1 = pnand %p84_p0, %p81_p13 }
  0x21   :  { %89 = shalt.err (!%p86_p1)
}
  0x22   :  { %38 = dma.vmem_to_hbm [thread:$0]  %s36_s19, 256, %s131_s1, [#allocation4]  }
  0x23   :  { %92 = dma.done.wait [#allocation4], 256  }
  0x24   :  { %93 = vsyncadd [#allocation4], 4294967040 }
  0x25   :  { %42 = vsyncpa [#allocation3], 1 }
  0x26   :  { %43 = vsyncpa [#allocation4], 1 }

</bundles_post_ra>
